<compile_context>
chip_gen: v5e
topology: v5e:2x2
jax: 0.10.0
libtpu: 0.0.40
codegen_flags: <defaults>
</compile_context>

<pallas_src>
import functools

import jax
import jax.numpy as jnp
from jax.experimental import pallas as pl
from jax.experimental.pallas import tpu as pltpu


def _basic_norm_kernel(eps_ref, x_ref, o_ref, *, inv_channels):
    # eps_ref : SMEM (1,) f32 holding exp(log_eps) (exp hoisted out of kernel).
    # x_ref/o_ref: VMEM tiles of shape (rows_tile, num_channels).
    xf = x_ref[...].astype(jnp.float32)                          # f32 accumulation
    mean_sq = jnp.sum(xf * xf, axis=-1, keepdims=True) * inv_channels
    scale = jax.lax.rsqrt(mean_sq + eps_ref[0])                  # EUP rsqrt
    # Multiply in f32 and downcast exactly once at the store.
    o_ref[...] = (xf * scale).astype(o_ref.dtype)


def basic_norm(x: jax.Array, log_eps: jax.Array, *, channel_dim: int = -1) -> jax.Array:
    """Pallas BasicNorm forward. `log_eps` is the learnable parameter (log of eps)."""
    ndim = x.ndim
    cdim = channel_dim if channel_dim >= 0 else ndim + channel_dim
    moved = cdim != ndim - 1
    if moved:
        # TODO(synk): this path costs two extra full HBM passes (XLA transposes);
        # an in-kernel sublane reduction would remove both for channel_dim=-2.
        x = jnp.moveaxis(x, cdim, -1)

    orig_shape = x.shape
    num_channels = orig_shape[-1]
    rows = 1
    for d in orig_shape[:-1]:
        rows *= d
    x2d = x.reshape(rows, num_channels)

    itemsize = jnp.dtype(x.dtype).itemsize
    bytes_per_row = num_channels * itemsize

    # --- Tile selection --------------------------------------------------------
    # Packed sublane multiple: 8 rows for f32, 16 for bf16, 32 for int8/fp8.
    sub_mult = max(8, 32 // itemsize)
    rows_pad = ((rows + sub_mult - 1) // sub_mult) * sub_mult

    # Per-block residency while in flight: 2x input + 2x output (double-buffered)
    # plus ~2 block-sized f32 intermediates inside the kernel body.
    f32_ratio = 4.0 / itemsize
    residency_factor = 4.0 + 2.0 * f32_ratio

    # Conservative working-set budget that fits every generation, including
    # v7x's 64 MiB/TC physical VMEM (default scoped limits are 16/32 MiB).
    working_set_budget = 40 * 1024 * 1024
    target_block_bytes = min(8 * 1024 * 1024,
                             int(working_set_budget / residency_factor))

    rows_tile = (target_block_bytes // bytes_per_row) // sub_mult * sub_mult
    rows_tile = max(sub_mult, rows_tile)
    rows_tile = min(rows_tile, rows_pad)

    # Prefer >= 4 grid steps (>= 2 blocks per TensorCore on dual-TC v7x) so both
    # cores keep prefetch/writeback overlapped, when there is enough work.
    min_steps = 4
    if pl.cdiv(rows, rows_tile) < min_steps and rows_pad >= min_steps * sub_mult:
        rows_tile = max(sub_mult,
                        ((rows_pad // min_steps + sub_mult - 1) // sub_mult) * sub_mult)
    grid = (pl.cdiv(rows, rows_tile),)

    block_bytes = rows_tile * num_channels * itemsize
    # TODO(synk): extremely wide channel counts (single sub_mult-row block still
    # exceeding the budget) would need a channel-axis split; production widths
    # (384/512) are far from that limit.
    vmem_limit = int(min(56 * 1024 * 1024,
                         max(16 * 1024 * 1024,
                             residency_factor * block_bytes + (2 << 20))))

    # Hoist the transcendental: one scalar exp outside the serial grid loop.
    eps_arr = jnp.exp(jnp.asarray(log_eps, dtype=jnp.float32)).reshape((1,))

    kernel = functools.partial(_basic_norm_kernel,
                               inv_channels=float(1.0 / num_channels))

    # Advisory cost hint: square+sum+scale ~ 3 flops/element, one rsqrt per row,
    # one read + one write of the tensor.
    cost = pl.CostEstimate(
        flops=3 * rows * num_channels,
        transcendentals=rows,
        bytes_accessed=2 * rows * num_channels * itemsize,
    )

    # TODO(synk): for num_channels < 128 (e.g. the C=32 demo) the store is
    # lane-masked; production BasicNorm widths (384/512) are already lane-dense,
    # and padding channels in HBM would cost more bandwidth than it saves.
    out2d = pl.pallas_call(
        kernel,
        out_shape=jax.ShapeDtypeStruct((rows, num_channels), x.dtype),
        grid_spec=pltpu.PrefetchScalarGridSpec(
            num_scalar_prefetch=0,
            grid=grid,
            in_specs=[
                pl.BlockSpec(memory_space=pltpu.SMEM),               # eps scalar
                pl.BlockSpec((rows_tile, num_channels), lambda i: (i, 0)),
            ],
            out_specs=pl.BlockSpec((rows_tile, num_channels), lambda i: (i, 0)),
        ),
        compiler_params=pltpu.CompilerParams(
            dimension_semantics=("parallel",),
            vmem_limit_bytes=vmem_limit,
        ),
        cost_estimate=cost,
    )(eps_arr, x2d)

    out = out2d.reshape(orig_shape)
    if moved:
        out = jnp.moveaxis(out, -1, cdim)
    return out


def basic_norm_ref(x, log_eps, channel_dim: int = -1):
    # Pure-JAX reference mirroring the PyTorch forward (math in f32, single cast).
    xf = x.astype(jnp.float32)
    scales = (jnp.mean(xf ** 2, axis=channel_dim, keepdims=True)
              + jnp.exp(log_eps)) ** (-0.5)
    return (xf * scales).astype(x.dtype)


if __name__ == "__main__":
    key = jax.random.PRNGKey(0)
    k0, k1, k2 = jax.random.split(key, 3)

    batch, seq, num_channels = 2, 8, 32
    x = jax.random.normal(k0, (batch, seq, num_channels), dtype=jnp.float32)

    # Parameter init exactly as in BasicNorm.__init__: eps=0.25 -> log(0.25).
    eps_init = 0.25
    log_eps = jnp.log(jnp.asarray(eps_init, dtype=jnp.float32))

    out = basic_norm(x, log_eps)
    out = jax.block_until_ready(out)
    ref = basic_norm_ref(x, log_eps)
    assert out.shape == x.shape and out.dtype == x.dtype
    assert jnp.allclose(out, ref, atol=1e-5, rtol=1e-5), "mismatch vs reference"

    # Ragged row count (rows = 15) exercises the cdiv grid + masked-tail path.
    x2 = jax.random.normal(k1, (3, 5, num_channels), dtype=jnp.float32)
    out2 = jax.block_until_ready(basic_norm(x2, log_eps))
    assert jnp.allclose(out2, basic_norm_ref(x2, log_eps), atol=1e-5, rtol=1e-5), \
        "mismatch vs reference (ragged rows)"

    # bf16 input exercises the dtype-aware (16-row) sublane rounding path.
    x3 = jax.random.normal(k2, (4, 8, num_channels), dtype=jnp.bfloat16)
    out3 = jax.block_until_ready(basic_norm(x3, log_eps))
    assert out3.dtype == jnp.bfloat16
    assert jnp.allclose(out3.astype(jnp.float32),
                        basic_norm_ref(x3, log_eps).astype(jnp.float32),
                        atol=2e-2, rtol=2e-2), "mismatch vs reference (bf16)"

    print("KERNEL_OK")
</pallas_src>

<mosaic_0001>
module attributes {stable_mosaic.version = 11 : i64} {
  func.func @_basic_norm_kernel(%arg0: i32, %arg1: memref<1xf32, #tpu.memory_space<smem>>, %arg2: memref<16x32xf32, #tpu.memory_space<vmem>>, %arg3: memref<16x32xf32, #tpu.memory_space<vmem>>) attributes {dimension_semantics = [#tpu.dimension_semantics<parallel>], iteration_bounds = array<i64: 1>, scalar_prefetch = 0 : i64, scratch_operands = 0 : i64, tpu.core_type = #tpu.core_type<tc>, window_params = [{transform_indices = @transform_0, window_bounds = array<i64: 1>}, {transform_indices = @transform_1, window_bounds = array<i64: 16, 32>}, {transform_indices = @transform_2, window_bounds = array<i64: 16, 32>}]} {
    %c0 = arith.constant 0 : index
    %c0_0 = arith.constant 0 : index
    %0 = vector.load %arg2[%c0, %c0_0] : memref<16x32xf32, #tpu.memory_space<vmem>>, vector<16x32xf32>
    %1 = arith.mulf %0, %0 : vector<16x32xf32>
    %cst = arith.constant dense<0.000000e+00> : vector<16xf32>
    %2 = vector.multi_reduction <add>, %1, %cst [1] : vector<16x32xf32> to vector<16xf32>
    %3 = vector.shape_cast %2 : vector<16xf32> to vector<16x1xf32>
    %cst_1 = arith.constant 3.125000e-02 : f32
    %4 = vector.broadcast %cst_1 : f32 to vector<16x1xf32>
    %5 = arith.mulf %3, %4 : vector<16x1xf32>
    %c0_2 = arith.constant 0 : index
    %6 = memref.load %arg1[%c0_2] : memref<1xf32, #tpu.memory_space<smem>>
    %7 = vector.broadcast %6 : f32 to vector<16x1xf32>
    %8 = arith.addf %5, %7 : vector<16x1xf32>
    %9 = math.rsqrt %8 : vector<16x1xf32>
    %10 = vector.broadcast %9 : vector<16x1xf32> to vector<16x32xf32>
    %11 = arith.mulf %0, %10 : vector<16x32xf32>
    %c0_3 = arith.constant 0 : index
    %c0_4 = arith.constant 0 : index
    %12 = vector.load %arg3[%c0_3, %c0_4] : memref<16x32xf32, #tpu.memory_space<vmem>>, vector<16x32xf32>
    tpu.vector_store %arg3[%c0_3, %c0_4], %11 {strides = array<i32>} : memref<16x32xf32, #tpu.memory_space<vmem>>, vector<16x32xf32>,
    return
  }
  func.func @transform_0(%arg0: i32) -> i32 {
    %c0_i32 = arith.constant 0 : i32
    %c0_i32_0 = arith.constant 0 : i32
    return %c0_i32 : i32
  }
  func.func @transform_1(%arg0: i32) -> (i32, i32) {
    %c0_i32 = arith.constant 0 : i32
    %c0_i32_0 = arith.constant 0 : i32
    return %arg0, %c0_i32 : i32, i32
  }
  func.func @transform_2(%arg0: i32) -> (i32, i32) {
    %c0_i32 = arith.constant 0 : i32
    %c0_i32_0 = arith.constant 0 : i32
    return %arg0, %c0_i32 : i32, i32
  }
}

</mosaic_0001>

<bundles_post_ra>
// kernel: tpu_custom_call.1
= control target key start
LH: loop header
LB: loop body
LE: loop exit
PB: predicated region body
PF: predicated region fallthrough
CT: control target
= control target key end

     0   :  { %8 = vsyncpa [#allocation4], 0  ;;  %s187_s0 = inlined_call_operand.<no memory space> [shape: f32[1], index: 0, kind: input, shape index: {}]   ;;  %s188_s1 = inlined_call_operand.hbm [shape: f32[16,32], index: 1, kind: input, shape index: {}]   ;;  %s189_s2 = inlined_call_operand.hbm [shape: f32[16,32], index: 2, kind: output, shape index: {}]  }
   0x1   :  { %9 = vsyncpa [#allocation5], 0  ;;  %s16_s11 = sshll.u32 %s188_s1, 4  ;;  %s149_s12 = smov [#allocation3]   ;;  %s17_s11 = int_to_ptr.hbm [resolvable:$true] %s16_s11 }
   0x2   :  { %s18_s13 = sshll.u32 %s149_s12, 4  ;;  %s150_s14 = smov 128   ;;  %s19_s13 = int_to_ptr.vmem [resolvable:$true] %s18_s13 }
   0x3   :  { %s151_s15 = smov 8  }
   0x4   :  { %24 = dma.hbm_to_vmem [thread:$0]  %s17_s11, 256, %s19_s13, [#allocation4], %s150_s14, %s150_s14, %s151_s15  }
   0x5   :  { %145 = dma.done.wait [#allocation4], 256  }
   0x6   :  { %146 = vsyncadd [#allocation4], 4294967040  ;;  %v29_v0 = vld [vmem:[#allocation3] sm:$0xff]  ;;  %vm33_vm0 = vcmask 261120   ;;  %v30_v2 = vld [vmem:[#allocation3 + $0x8] sm:$0xff]  ;;  %v43_v6 = vstv %s187_s0  ;;  %s152_s0 = smov [#allocation6]  }
   0x7   :  { %v31_v1 = vmul.f32 %v29_v0, %v29_v0  ;;  %v32_v4 = vmul.f32 %v30_v2, %v30_v2  ;;  %s74_s17 = sshll.u32 %s152_s0, 4  ;;  %s76_s20 = sshll.u32 %s189_s2, 4  ;;  %s75_s17 = int_to_ptr.vmem [resolvable:$true] %s74_s17  ;;  %s77_s20 = int_to_ptr.hbm [resolvable:$true] %s76_s20 }
   0x9   :  { %v34_v3 = vsel %vm33_vm0, %v31_v1, 0.0  ;;  %v37_v5 = vsel %vm33_vm0, %v32_v4, 0.0 }
   0xa   :  { %35 = vadd.xlane.f32.xlu0 %v34_v3 }
  0x12   :  { %38 = vadd.xlane.f32.xlu0 %v37_v5 }
  0x7d   :  { %v36_v7 = vpop.xlane.xlu0 %35 }
  0x7e   :  { %v40_v8 = vmul.f32 0.03125, %v36_v7 }
  0x80   :  { %v44_v9 = vadd.f32 %v43_v6, %v40_v8 }
  0x82   :  { %93 = vrsqrt.f32 %v44_v9  ;;  %vm52_vm2 = vweird.f32 %v44_v9 }
  0x85   :  { %v39_v10 = vpop.xlane.xlu0 %38 }
  0x86   :  { %v41_v11 = vmul.f32 0.03125, %v39_v10 }
  0x88   :  { %v94_v12 = vpop.eup %93  ;;  %v45_v13 = vadd.f32 %v43_v6, %v41_v11 }
  0x89   :  { %v47_v14 = vmul.f32 %v94_v12, %v44_v9  ;;  %vm53_vm1 = vweird.f32 %v94_v12 }
  0x8a   :  { %95 = vrsqrt.f32 %v45_v13  ;;  %vm54_vm3 = vmor %vm52_vm2, %vm53_vm1  ;;  %vm62_vm5 = vweird.f32 %v45_v13 }
  0x8b   :  { %v48_v15 = vmul.f32 %v94_v12, %v47_v14 }
  0x8d   :  { %v49_v16 = vmul.f32 0.5, %v48_v15 }
  0x8f   :  { %v50_v17 = vsub.f32 1.5, %v49_v16 }
  0x90   :  { %v96_v18 = vpop.eup %95 }
  0x91   :  { %v51_v19 = vmul.f32 %v94_v12, %v50_v17  ;;  %v57_v20 = vmul.f32 %v96_v18, %v45_v13  ;;  %vm63_vm4 = vweird.f32 %v96_v18 }
  0x92   :  { %vm64_vm6 = vmor %vm62_vm5, %vm63_vm4 }
  0x93   :  { %v55_v21 = vsel %vm54_vm3, %v94_v12, %v51_v19  ;;  %v58_v22 = vmul.f32 %v96_v18, %v57_v20 }
  0x94   :  { %v66_v23 = vmul.f32 %v55_v21, %v29_v0 }
  0x95   :  { %v59_v24 = vmul.f32 0.5, %v58_v22 }
  0x96   :  { %68 = vst.msk [vmem:[#allocation6] sm:$0xff] %vm33_vm0, %v66_v23 }
  0x97   :  { %v60_v25 = vsub.f32 1.5, %v59_v24 }
  0x99   :  { %v61_v26 = vmul.f32 %v96_v18, %v60_v25 }
  0x9b   :  { %v65_v27 = vsel %vm64_vm6, %v96_v18, %v61_v26 }
  0x9c   :  { %v67_v28 = vmul.f32 %v65_v27, %v30_v2 }
  0x9e   :  { %69 = vst.msk [vmem:[#allocation6 + $0x8] sm:$0xff] %vm33_vm0, %v67_v28 }
  0x9f   :  { %82 = dma.vmem_to_hbm [thread:$0]  %s75_s17, 256, %s77_s20, [#allocation5], %s150_s14, %s150_s14, %s151_s15  }
  0xa0   :  { %147 = dma.done.wait [#allocation5], 256  }
  0xa1   :  { %148 = vsyncadd [#allocation5], 4294967040 }
  0xa2   :  { %87 = vsyncpa [#allocation4], 1 }
  0xa3   :  { %88 = vsyncpa [#allocation5], 1 }

</bundles_post_ra>
